<compile_context>
chip_gen: v5e
topology: v5e:2x2
jax: 0.10.0
libtpu: 0.0.40
codegen_flags: <defaults>
</compile_context>

<pallas_src>
import functools
import math

import jax
import jax.numpy as jnp
import numpy as np
from jax.experimental import pallas as pl
from jax.experimental.pallas import tpu as pltpu


def _round_up(x, k):
    return ((x + k - 1) // k) * k


def _ope_tables(max_freq):
    """Constant tables: packed (4, c) [fx, px, fy, py] and amp-folded (3c, 3) selector."""
    d = 2 * max_freq + 1
    c = d * d
    idx = np.arange(d)
    freq1 = ((idx + 1) // 2).astype(np.float32)                       # 0,1,1,2,2,...
    phase1 = np.where(idx == 0, 0.0,
                      np.where(idx % 2 == 1, 0.0, -np.pi / 2)).astype(np.float32)
    amp1 = np.where(idx == 0, 1.0, math.sqrt(2.0)).astype(np.float32)

    k = np.arange(c)
    ii = k // d                      # selects the X-embed element
    jj = k % d                       # selects the Y-embed element
    tbl = np.stack([freq1[ii], phase1[ii], freq1[jj], phase1[jj]], axis=0)  # (4, c)
    amp = (amp1[ii] * amp1[jj]).astype(np.float32)                          # (c,)

    sel = np.zeros((3 * c, 3), dtype=np.float32)                            # amp-folded selector
    for color in range(3):
        sel[color * c:(color + 1) * c, color] = amp
    return tbl.astype(np.float32), sel


def _lc_ope_kernel(tbl_ref, sel_ref, coord_ref, latent_ref, out_ref, *, omega):
    tbl = tbl_ref[...]                                   # (4, c), grid-invariant
    fx, px = tbl[0:1, :], tbl[1:2, :]
    fy, py = tbl[2:3, :], tbl[3:4, :]

    coords = coord_ref[...].astype(jnp.float32)          # (TM, 2)
    t_x = coords[:, 0:1] * omega                         # (TM, 1)
    t_y = coords[:, 1:2] * omega                         # (TM, 1)

    # The only EUP work: 2 cos arrays of shape (TM, c) per tile.
    cos_x = jnp.cos(t_x * fx + px)                       # (TM, c)
    cos_y = jnp.cos(t_y * fy + py)                       # (TM, c)
    ope = cos_x * cos_y                                  # (TM, c); sqrt(2) amps live in sel

    ope3 = jnp.concatenate([ope, ope, ope], axis=1)      # (TM, 3c)
    # bf16 latent promotes to f32 inside the multiply (no separate full-block cast pass).
    w = latent_ref[...] * ope3                           # (TM, 3c) f32

    # Per-color channel reduction on the MXU; rows are independent, so garbage lanes of a
    # partial edge block stay in their own (dropped) output rows.
    out = jnp.dot(w, sel_ref[...], preferred_element_type=jnp.float32)   # (TM, 3)
    out_ref[...] = out.astype(out_ref.dtype)


def lc_ope_forward(latent, rel_coord, *, max_freq, omega, tile_m=8192, out_dtype=None):
    """latent: (N, bsize, 3*c)   rel_coord: (N, bsize, 2)   ->  (N, bsize, 3)"""
    d = 2 * max_freq + 1
    c = d * d
    n, bsize, ch = latent.shape
    assert ch == 3 * c, f"latent last dim {ch} != 3*(2*max_freq+1)^2 = {3 * c}"
    assert rel_coord.shape == (n, bsize, 2)

    m = n * bsize
    lat = latent.reshape(m, 3 * c)         # free reshape: latent streamed once, row-major
    coord = rel_coord.reshape(m, 2)

    # Sublane granularity of the latent dtype (f32: 8 rows, bf16: 16, int8/fp8: 32).
    sub = 8 * max(1, 4 // jnp.dtype(latent.dtype).itemsize)
    tm = max(sub, min(int(tile_m), _round_up(m, sub)))
    tm = _round_up(tm, sub)
    num_tiles = pl.cdiv(m, tm)             # uneven tail handled by the masked edge block

    tbl_np, sel_np = _ope_tables(max_freq)
    tbl = jnp.asarray(tbl_np)              # (4, c)
    sel = jnp.asarray(sel_np)              # (3c, 3)

    kernel = functools.partial(_lc_ope_kernel, omega=float(omega))
    out = pl.pallas_call(
        kernel,
        out_shape=jax.ShapeDtypeStruct((m, 3), out_dtype or latent.dtype),
        grid=(num_tiles,),
        in_specs=[
            pl.BlockSpec((4, c), lambda i: (0, 0)),          # grid-invariant tables
            pl.BlockSpec((3 * c, 3), lambda i: (0, 0)),      # grid-invariant selector
            pl.BlockSpec((tm, 2), lambda i: (i, 0)),         # coords
            pl.BlockSpec((tm, 3 * c), lambda i: (i, 0)),     # latent: the big HBM stream
        ],
        out_specs=pl.BlockSpec((tm, 3), lambda i: (i, 0)),
        compiler_params=pltpu.CompilerParams(
            dimension_semantics=("parallel",)),
    )(tbl, sel, coord, lat)

    return out.reshape(n, bsize, 3)


def _lc_ope_reference(latent, rel_coord, *, max_freq, omega):
    """Pure-JAX reference mirroring the PyTorch module exactly."""
    d = 2 * max_freq + 1
    c = d * d
    x = rel_coord[:, :, 0] * omega
    y = rel_coord[:, :, 1] * omega

    def embed(t):  # (N, bsize) -> (N, bsize, d)
        cols = [jnp.ones_like(t)]
        for i in range(1, max_freq + 1):
            cols.append(math.sqrt(2) * jnp.cos(t * i))
            cols.append(math.sqrt(2) * jnp.sin(t * i))
        return jnp.stack(cols, axis=-1)

    X = embed(x)
    Y = embed(y)
    ope = (X[..., :, None] * Y[..., None, :]).reshape(*x.shape, c)
    r = jnp.sum(ope * latent[..., :c], axis=-1, keepdims=True)
    g = jnp.sum(ope * latent[..., c:2 * c], axis=-1, keepdims=True)
    b = jnp.sum(ope * latent[..., 2 * c:], axis=-1, keepdims=True)
    return jnp.concatenate([r, g, b], axis=-1)


if __name__ == "__main__":
    max_freq = 2                      # -> d = 5, c = 25, latent channels = 75
    omega = 0.5
    c = (2 * max_freq + 1) ** 2

    key = jax.random.PRNGKey(0)

    # Case 1: tiny shape (single block).
    N, bsize = 2, 8
    k_lat, k_coord, key = jax.random.split(key, 3)
    latent = jax.random.normal(k_lat, (N, bsize, 3 * c), dtype=jnp.float32)
    rel_coord = jax.random.uniform(k_coord, (N, bsize, 2), dtype=jnp.float32,
                                   minval=-1.0, maxval=1.0)
    out = jax.block_until_ready(
        lc_ope_forward(latent, rel_coord, max_freq=max_freq, omega=omega))
    ref = _lc_ope_reference(latent, rel_coord, max_freq=max_freq, omega=omega)
    np.testing.assert_allclose(np.asarray(out), np.asarray(ref), rtol=1e-4, atol=1e-4)

    # Case 2: multi-tile grid with an uneven tail (M = 685, tile_m = 256 -> 3 steps).
    N2, bsize2 = 5, 137
    k_lat2, k_coord2, key = jax.random.split(key, 3)
    latent2 = jax.random.normal(k_lat2, (N2, bsize2, 3 * c), dtype=jnp.float32)
    rel_coord2 = jax.random.uniform(k_coord2, (N2, bsize2, 2), dtype=jnp.float32,
                                    minval=-1.0, maxval=1.0)
    out2 = jax.block_until_ready(
        lc_ope_forward(latent2, rel_coord2, max_freq=max_freq, omega=omega,
                       tile_m=256))
    ref2 = _lc_ope_reference(latent2, rel_coord2, max_freq=max_freq, omega=omega)
    np.testing.assert_allclose(np.asarray(out2), np.asarray(ref2), rtol=1e-4, atol=1e-4)

    # Case 3: bf16 latent over HBM (halves the dominant stream), f32 accumulate/output.
    latent2_bf16 = latent2.astype(jnp.bfloat16)
    out3 = jax.block_until_ready(
        lc_ope_forward(latent2_bf16, rel_coord2, max_freq=max_freq, omega=omega,
                       tile_m=256, out_dtype=jnp.float32))
    ref3 = _lc_ope_reference(latent2_bf16.astype(jnp.float32), rel_coord2,
                             max_freq=max_freq, omega=omega)
    np.testing.assert_allclose(np.asarray(out3), np.asarray(ref3), rtol=1e-4, atol=1e-4)

    print("KERNEL_OK")
</pallas_src>

<mosaic_0001>
module attributes {stable_mosaic.version = 11 : i64} {
  func.func @_lc_ope_kernel(%arg0: i32, %arg1: memref<4x25xf32, #tpu.memory_space<vmem>>, %arg2: memref<75x3xf32, #tpu.memory_space<vmem>>, %arg3: memref<16x2xf32, #tpu.memory_space<vmem>>, %arg4: memref<16x75xf32, #tpu.memory_space<vmem>>, %arg5: memref<16x3xf32, #tpu.memory_space<vmem>>) attributes {dimension_semantics = [#tpu.dimension_semantics<parallel>], iteration_bounds = array<i64: 1>, scalar_prefetch = 0 : i64, scratch_operands = 0 : i64, tpu.core_type = #tpu.core_type<tc>, window_params = [{pipeline_mode = #tpu.pipeline_mode<synchronous>, transform_indices = @transform_0, window_bounds = array<i64: 4, 25>}, {pipeline_mode = #tpu.pipeline_mode<synchronous>, transform_indices = @transform_1, window_bounds = array<i64: 75, 3>}, {transform_indices = @transform_2, window_bounds = array<i64: 16, 2>}, {transform_indices = @transform_3, window_bounds = array<i64: 16, 75>}, {transform_indices = @transform_4, window_bounds = array<i64: 16, 3>}]} {
    %c0 = arith.constant 0 : index
    %c0_0 = arith.constant 0 : index
    %0 = vector.load %arg1[%c0, %c0_0] : memref<4x25xf32, #tpu.memory_space<vmem>>, vector<4x25xf32>
    %1 = vector.extract_strided_slice %0 {offsets = [0, 0], sizes = [1, 25], strides = [1, 1]} : vector<4x25xf32> to vector<1x25xf32>
    %2 = vector.extract_strided_slice %0 {offsets = [1, 0], sizes = [1, 25], strides = [1, 1]} : vector<4x25xf32> to vector<1x25xf32>
    %3 = vector.extract_strided_slice %0 {offsets = [2, 0], sizes = [1, 25], strides = [1, 1]} : vector<4x25xf32> to vector<1x25xf32>
    %4 = vector.extract_strided_slice %0 {offsets = [3, 0], sizes = [1, 25], strides = [1, 1]} : vector<4x25xf32> to vector<1x25xf32>
    %c0_1 = arith.constant 0 : index
    %c0_2 = arith.constant 0 : index
    %5 = vector.load %arg3[%c0_1, %c0_2] : memref<16x2xf32, #tpu.memory_space<vmem>>, vector<16x2xf32>
    %6 = vector.extract_strided_slice %5 {offsets = [0, 0], sizes = [16, 1], strides = [1, 1]} : vector<16x2xf32> to vector<16x1xf32>
    %cst = arith.constant 5.000000e-01 : f32
    %7 = vector.broadcast %cst : f32 to vector<16x1xf32>
    %8 = arith.mulf %6, %7 : vector<16x1xf32>
    %9 = vector.extract_strided_slice %5 {offsets = [0, 1], sizes = [16, 1], strides = [1, 1]} : vector<16x2xf32> to vector<16x1xf32>
    %cst_3 = arith.constant 5.000000e-01 : f32
    %10 = vector.broadcast %cst_3 : f32 to vector<16x1xf32>
    %11 = arith.mulf %9, %10 : vector<16x1xf32>
    %12 = vector.broadcast %8 : vector<16x1xf32> to vector<16x25xf32>
    %13 = vector.broadcast %1 : vector<1x25xf32> to vector<16x25xf32>
    %14 = arith.mulf %12, %13 : vector<16x25xf32>
    %15 = vector.broadcast %2 : vector<1x25xf32> to vector<16x25xf32>
    %16 = arith.addf %14, %15 : vector<16x25xf32>
    %17 = math.cos %16 : vector<16x25xf32>
    %18 = vector.broadcast %11 : vector<16x1xf32> to vector<16x25xf32>
    %19 = vector.broadcast %3 : vector<1x25xf32> to vector<16x25xf32>
    %20 = arith.mulf %18, %19 : vector<16x25xf32>
    %21 = vector.broadcast %4 : vector<1x25xf32> to vector<16x25xf32>
    %22 = arith.addf %20, %21 : vector<16x25xf32>
    %23 = math.cos %22 : vector<16x25xf32>
    %24 = arith.mulf %17, %23 : vector<16x25xf32>
    %25 = tpu.concatenate %24, %24, %24 in 1 : vector<16x25xf32>, vector<16x25xf32>, vector<16x25xf32> -> vector<16x75xf32>
    %c0_4 = arith.constant 0 : index
    %c0_5 = arith.constant 0 : index
    %26 = vector.load %arg4[%c0_4, %c0_5] : memref<16x75xf32, #tpu.memory_space<vmem>>, vector<16x75xf32>
    %27 = arith.mulf %26, %25 : vector<16x75xf32>
    %c0_6 = arith.constant 0 : index
    %c0_7 = arith.constant 0 : index
    %28 = vector.load %arg2[%c0_6, %c0_7] : memref<75x3xf32, #tpu.memory_space<vmem>>, vector<75x3xf32>
    %cst_8 = arith.constant dense<0.000000e+00> : vector<16x3xf32>
    %29 = tpu.matmul %27, %28, %cst_8 {dimension_numbers = #tpu.dot_dimension_numbers<[1], [0], [0], [1], [0, 0, 1, 1], [], []>} : vector<16x75xf32>, vector<75x3xf32>, vector<16x3xf32> -> vector<16x3xf32>
    %c0_9 = arith.constant 0 : index
    %c0_10 = arith.constant 0 : index
    %30 = vector.load %arg5[%c0_9, %c0_10] : memref<16x3xf32, #tpu.memory_space<vmem>>, vector<16x3xf32>
    tpu.vector_store %arg5[%c0_9, %c0_10], %29 {strides = array<i32>} : memref<16x3xf32, #tpu.memory_space<vmem>>, vector<16x3xf32>,
    return
  }
  func.func @transform_0(%arg0: i32) -> (i32, i32) {
    %c0_i32 = arith.constant 0 : i32
    %c0_i32_0 = arith.constant 0 : i32
    %c0_i32_1 = arith.constant 0 : i32
    return %c0_i32, %c0_i32_0 : i32, i32
  }
  func.func @transform_1(%arg0: i32) -> (i32, i32) {
    %c0_i32 = arith.constant 0 : i32
    %c0_i32_0 = arith.constant 0 : i32
    %c0_i32_1 = arith.constant 0 : i32
    return %c0_i32, %c0_i32_0 : i32, i32
  }
  func.func @transform_2(%arg0: i32) -> (i32, i32) {
    %c0_i32 = arith.constant 0 : i32
    %c0_i32_0 = arith.constant 0 : i32
    return %arg0, %c0_i32 : i32, i32
  }
  func.func @transform_3(%arg0: i32) -> (i32, i32) {
    %c0_i32 = arith.constant 0 : i32
    %c0_i32_0 = arith.constant 0 : i32
    return %arg0, %c0_i32 : i32, i32
  }
  func.func @transform_4(%arg0: i32) -> (i32, i32) {
    %c0_i32 = arith.constant 0 : i32
    %c0_i32_0 = arith.constant 0 : i32
    return %arg0, %c0_i32 : i32, i32
  }
}

</mosaic_0001>

<bundles_post_ra>
// kernel: tpu_custom_call.1
= control target key start
LH: loop header
LB: loop body
LE: loop exit
PB: predicated region body
PF: predicated region fallthrough
CT: control target
= control target key end

     0   :  { %v783_v0 = vmov 1   ;;  %v784_v1 = vmov 0   ;;  %v785_v34 = vmov 1326507024   ;;  %v786_v39 = vmov 2131351028   ;;  %s1496_s2 = inlined_call_operand.vmem [shape: f32[16,2], index: 2, kind: input, shape index: {}]   ;;  %s1497_s0 = inlined_call_operand.vmem [shape: f32[4,25], index: 0, kind: input, shape index: {}]   ;;  %s1498_s1 = inlined_call_operand.vmem [shape: f32[75,3], index: 1, kind: input, shape index: {}]   ;;  %s1499_s3 = inlined_call_operand.vmem [shape: f32[16,75], index: 3, kind: input, shape index: {}]   ;;  %s1500_s4 = inlined_call_operand.vmem [shape: f32[16,3], index: 4, kind: output, shape index: {}]  }
   0x1   :  { %781 = vset.pattern.permute.xlu1 %v783_v0  ;;  %780 = vset.pattern.permute.xlu0 %v784_v1  ;;  %v18_v2 = vld [vmem:[%s1496_s2] sm:$0xff]  ;;  %v19_v4 = vld [vmem:[%s1496_s2 + $0x8] sm:$0xff]  ;;  %v787_v41 = vmov 2102212464   ;;  %v788_v43 = vmov 920167782  }
   0x2   :  { %v20_v3 = vmul.f32 0.5, %v18_v2  ;;  %v21_v5 = vmul.f32 0.5, %v19_v4  ;;  %v828_v6 = vld [vmem:[%s1497_s0] sm:$0xf]  ;;  %v789_v49 = vmov 2475754826  }
   0x3   :  { %v354_v7 = vperm.slane %v828_v6, 2  ;;  %v32_v8 = vperm.slane %v828_v6, 0  ;;  %v357_v9 = vperm.slane %v828_v6, 3  ;;  %v35_v10 = vperm.slane %v828_v6, 1  ;;  %s791_s0 = smov 50   ;;  %s792_s2 = smov 25  }
   0x4   :  { %347 = vperm.xlu1 %781, %v20_v3   ;;  %24 = vperm.xlu0 %780, %v20_v3   ;;  %v1505_v63 = vmov 683565275  }
   0xc   :  { %351 = vperm.xlu1 %781, %v21_v5   ;;  %29 = vperm.xlu0 %780, %v21_v5  }
  0x14   :  { %782 = vset.pattern.permute.xlu0 %v783_v0 }
  0x76   :  { %v348_v11 = vpop.permute.xlu1 %347  ;;  %v25_v12 = vpop.permute.xlu0 %24 }
  0x77   :  { %v355_v13 = vmul.f32 %v354_v7, %v348_v11  ;;  %v33_v14 = vmul.f32 %v32_v8, %v25_v12 }
  0x79   :  { %v834_v15 = vadd.f32 %v357_v9, %v355_v13  ;;  %v836_v16 = vadd.f32 %v35_v10, %v33_v14 }
  0x7b   :  { %v363_v17 = vand.u32 2139095040, %v834_v15  ;;  %v41_v18 = vand.u32 2139095040, %v836_v16  ;;  %v1503_v25 = vand.u32 2147483647, %v834_v15  ;;  %v1504_v27 = vand.u32 2147483647, %v836_v16 }
  0x7d   :  { %v364_v19 = vshrl.u32 %v363_v17, 23  ;;  %v42_v20 = vshrl.u32 %v41_v18, 23  ;;  %v367_v32 = vand.u32 8388607, %v1503_v25  ;;  %v45_v33 = vand.u32 8388607, %v1504_v27 }
  0x7e   :  { %v352_v31 = vpop.permute.xlu1 %351  ;;  %v30_v38 = vpop.permute.xlu0 %29 }
  0x7f   :  { %v751_v21 = vadd.s32 4294967169, %v364_v19  ;;  %v745_v22 = vadd.s32 4294967169, %v42_v20  ;;  %v356_v37 = vmul.f32 %v354_v7, %v352_v31  ;;  %v368_v45 = vor.u32 8388608, %v367_v32 }
  0x80   :  { %v46_v48 = vor.u32 8388608, %v45_v33  ;;  %v34_v53 = vmul.f32 %v32_v8, %v30_v38 }
  0x81   :  { %v370_v23 = vadd.s32 1, %v751_v21  ;;  %v48_v24 = vadd.s32 1, %v745_v22  ;;  %v862_v56 = vadd.f32 %v357_v9, %v356_v37  ;;  %v869_v61 = vshll.u32 %v368_v45, 8 }
  0x82   :  { %v871_v62 = vshll.u32 %v46_v48, 8  ;;  %v878_v4 = vadd.f32 %v35_v10, %v34_v53 }
  0x83   :  { %vm371_vm0 = vcmp.gt.s32.totalorder %v370_v23, 0  ;;  %vm49_vm1 = vcmp.gt.s32.totalorder %v48_v24, 0  ;;  %v517_v7 = vand.u32 2139095040, %v862_v56 }
  0x84   :  { %v372_v26 = vsel %vm371_vm0, %v370_v23, 0  ;;  %v50_v30 = vsel %vm49_vm1, %v48_v24, 0 }
  0x85   :  { %v374_v28 = vand.u32 31, %v372_v26  ;;  %v52_v36 = vand.u32 31, %v50_v30  ;;  %v855_v46 = vshrl.u32 %v372_v26, 5  ;;  %v876_v3 = vshrl.u32 %v50_v30, 5 }
  0x86   :  { %v905_v26 = vand.u32 65535, %v869_v61  ;;  %v1501_v30 = vand.u32 2147483647, %v862_v56  ;;  %v518_v37 = vshrl.u32 %v517_v7, 23  ;;  %v195_v7 = vand.u32 2139095040, %v878_v4 }
  0x87   :  { %v842_v29 = vsub.s32 32, %v374_v28  ;;  %v389_v44 = vshll.u32 %v788_v43, %v374_v28  ;;  %v380_v50 = vshll.u32 %v789_v49, %v374_v28  ;;  %v383_v51 = vshll.u32 %v786_v39, %v374_v28 }
  0x88   :  { %v386_v54 = vshll.u32 %v787_v41, %v374_v28  ;;  %v53_v55 = vsub.s32 32, %v52_v36  ;;  %vm395_vm2 = vcmp.lt.s32.totalorder %v855_v46, 4  ;;  %v377_v0 = vshll.u32 %v1505_v63, %v374_v28 }
  0x89   :  { %v390_v35 = vshrl.u32 %v785_v34, %v842_v29  ;;  %v381_v40 = vshrl.u32 %v786_v39, %v842_v29  ;;  %v384_v42 = vshrl.u32 %v787_v41, %v842_v29  ;;  %v387_v47 = vshrl.u32 %v788_v43, %v842_v29 }
  0x8a   :  { %v378_v57 = vshrl.u32 %v789_v49, %v842_v29  ;;  %vm392_vm3 = vcmp.lt.s32.totalorder %v855_v46, 1  ;;  %v59_v5 = vshrl.u32 %v786_v39, %v53_v55  ;;  %v62_v6 = vshrl.u32 %v787_v41, %v53_v55 }
  0x8b   :  { %v391_v52 = vor.u32 %v390_v35, %v389_v44  ;;  %v866_v58 = vor.u32 %v381_v40, %v380_v50  ;;  %v385_v59 = vor.u32 %v384_v42, %v383_v51  ;;  %v388_v60 = vor.u32 %v387_v47, %v386_v54 }
  0x8c   :  { %v379_v8 = vor.u32 %v378_v57, %v377_v0  ;;  %vm394_vm4 = vcmp.lt.s32.totalorder %v855_v46, 3  ;;  %v58_v11 = vshll.u32 %v789_v49, %v52_v36  ;;  %v61_v12 = vshll.u32 %v786_v39, %v52_v36 }
  0x8d   :  { %v405_v2 = vsel %vm395_vm2, %v391_v52, 1326507024  ;;  %v404_v9 = vsel %vm392_vm3, %v866_v58, %v385_v59  ;;  %v64_v13 = vshll.u32 %v787_v41, %v52_v36  ;;  %v65_v14 = vshrl.u32 %v788_v43, %v53_v55 }
  0x8e   :  { %v406_v10 = vsel %vm394_vm4, %v388_v60, %v405_v2  ;;  %vm393_vm5 = vcmp.lt.s32.totalorder %v855_v46, 2  ;;  %v401_v17 = vsel %vm395_vm2, %v388_v60, 920167782  ;;  %v67_v18 = vshll.u32 %v788_v43, %v52_v36 }
  0x8f   :  { %v68_v19 = vshrl.u32 %v785_v34, %v53_v55  ;;  %v56_v20 = vshrl.u32 %v789_v49, %v53_v55  ;;  %v60_v21 = vor.u32 %v59_v5, %v58_v11  ;;  %v63_v22 = vor.u32 %v62_v6, %v61_v12 }
  0x90   :  { %v66_v23 = vor.u32 %v65_v14, %v64_v13  ;;  %v902_v24 = vsel %vm393_vm5, %v404_v9, %v406_v10  ;;  %v400_v31 = vsel %vm392_vm3, %v379_v8, %v866_v58  ;;  %v402_v32 = vsel %vm394_vm4, %v385_v59, %v401_v17 }
  0x91   :  { %v69_v28 = vor.u32 %v68_v19, %v67_v18  ;;  %v55_v33 = vshll.u32 %v1505_v63, %v52_v36  ;;  %vm73_vm6 = vcmp.lt.s32.totalorder %v876_v3, 4  ;;  %vm70_vm7 = vcmp.lt.s32.totalorder %v876_v3, 1 }
  0x92   :  { %vm72_vm8 = vcmp.lt.s32.totalorder %v876_v3, 3  ;;  %v412_v38 = vshrl.u32 %v902_v24, 16  ;;  %v82_v42 = vsel %vm70_vm7, %v60_v21, %v63_v22  ;;  %v925_v36 = vshrl.u32 %v869_v61, 16 }
  0x93   :  { %v83_v35 = vsel %vm73_vm6, %v69_v28, 1326507024  ;;  %v57_v40 = vor.u32 %v56_v20, %v55_v33  ;;  %v79_v45 = vsel %vm73_vm6, %v66_v23, 920167782  ;;  %v930_v47 = vand.u32 65535, %v871_v62 }
  0x94   :  { %v84_v44 = vsel %vm72_vm8, %v66_v23, %v83_v35  ;;  %v521_v48 = vand.u32 8388607, %v1501_v30  ;;  %v376_v50 = vshrl.u32 %v1505_v63, %v842_v29  ;;  %v397_v51 = vsel %vm395_vm2, %v385_v59, 2102212464 }
  0x95   :  { %vm71_vm9 = vcmp.lt.s32.totalorder %v876_v3, 2  ;;  %v754_v52 = vadd.s32 4294967169, %v518_v37  ;;  %v941_v53 = vsel %vm393_vm5, %v400_v31, %v402_v32  ;;  %v54_v54 = vshrl.u32 %v1505_v63, %v53_v55 }
  0x96   :  { %v75_v57 = vsel %vm73_vm6, %v63_v22, 2102212464  ;;  %v85_v60 = vsel %vm71_vm9, %v82_v42, %v84_v44  ;;  %v949_v29 = vmul.u32 %v412_v38, %v905_v26  ;;  %v78_v59 = vsel %vm70_vm7, %v57_v40, %v60_v21 }
  0x97   :  { %v80_v0 = vsel %vm72_vm8, %v63_v22, %v79_v45  ;;  %v524_v2 = vadd.s32 1, %v754_v52  ;;  %v396_v5 = vsel %vm392_vm3, %v376_v50, %v379_v8  ;;  %v398_v55 = vsel %vm394_vm4, %v866_v58, %v397_v51 }
  0x98   :  { %v1507_v6 = vand.u32 65535, %v902_v24  ;;  %v74_v9 = vsel %vm70_vm7, %v54_v54, %v57_v40  ;;  %v76_v11 = vsel %vm72_vm8, %v60_v21, %v75_v57  ;;  %v90_v10 = vshrl.u32 %v85_v60, 16 }
  0x99   :  { %vm525_vm10 = vcmp.gt.s32.totalorder %v524_v2, 0  ;;  %v434_v12 = vshrl.u32 %v941_v53, 16  ;;  %v969_v8 = vsel %vm71_vm9, %v78_v59, %v80_v0  ;;  %v196_v58 = vshrl.u32 %v195_v7, 23 }
  0x9a   :  { %v526_v13 = vsel %vm525_vm10, %v524_v2, 0  ;;  %v973_v14 = vsel %vm393_vm5, %v396_v5, %v398_v55  ;;  %v417_v17 = vshll.u32 %v949_v29, 16  ;;  %v1502_v19 = vand.u32 2147483647, %v878_v4 }
  0x9b   :  { %v528_v18 = vand.u32 31, %v526_v13  ;;  %v980_v20 = vmul.u32 %v1507_v6, %v905_v26  ;;  %v984_v21 = vsel %vm71_vm9, %v74_v9, %v76_v11  ;;  %v987_v22 = vshrl.u32 %v871_v62, 16 }
  0x9c   :  { %v522_v46 = vor.u32 8388608, %v521_v48  ;;  %v990_v23 = vmul.u32 %v90_v10, %v930_v47  ;;  %v112_v28 = vshrl.u32 %v969_v8, 16  ;;  %v748_v32 = vadd.s32 4294967169, %v196_v58 }
  0x9d   :  { %v993_v31 = vsub.s32 32, %v528_v18  ;;  %v996_v33 = vmul.u32 %v412_v38, %v925_v36  ;;  %v1000_v3 = vmul.u32 %v434_v12, %v905_v26  ;;  %v1007_v40 = vadd.s32 %v417_v17, %v980_v20 }
  0x9e   :  { %v1010_v42 = vmul.u32 %v434_v12, %v925_v36  ;;  %v199_v38 = vand.u32 8388607, %v1502_v19  ;;  %v89_v45 = vand.u32 65535, %v85_v60  ;;  %v1019_v51 = vshll.u32 %v522_v46, 8 }
  0x9f   :  { %v544_v50 = vshrl.u32 %v785_v34, %v993_v31  ;;  %v95_v52 = vshll.u32 %v990_v23, 16  ;;  %v1023_v54 = vmul.u32 %v112_v28, %v930_v47  ;;  %v1026_v57 = vmul.u32 %v112_v28, %v987_v22 }
  0xa0   :  { %v202_v59 = vadd.s32 1, %v748_v32  ;;  %v532_v60 = vshrl.u32 %v789_v49, %v993_v31  ;;  %v535_v0 = vshrl.u32 %v786_v39, %v993_v31  ;;  %v538_v2 = vshrl.u32 %v787_v41, %v993_v31 }
  0xa1   :  { %v543_v5 = vshll.u32 %v788_v43, %v528_v18  ;;  %v1035_v55 = vshrl.u32 %v526_v13, 5  ;;  %v531_v7 = vshll.u32 %v1505_v63, %v528_v18  ;;  %v541_v9 = vshrl.u32 %v788_v43, %v993_v31 }
  0xa2   :  { %v200_v11 = vor.u32 8388608, %v199_v38  ;;  %v534_v12 = vshll.u32 %v789_v49, %v528_v18  ;;  %v537_v58 = vshll.u32 %v786_v39, %v528_v18  ;;  %vm203_vm11 = vcmp.gt.s32.totalorder %v202_v59, 0 }
  0xa3   :  { %v545_v46 = vor.u32 %v544_v50, %v543_v5  ;;  %v91_v28 = vmul.u32 %v89_v45, %v930_v47  ;;  %v540_v32 = vshll.u32 %v787_v41, %v528_v18  ;;  %v204_v30 = vsel %vm203_vm11, %v202_v59, 0 }
  0xa4   :  { %v1045_v13 = vmul.u32 %v89_v45, %v987_v22  ;;  %v94_v19 = vmul.u32 %v90_v10, %v987_v22  ;;  %v1048_v25 = vor.u32 %v532_v60, %v531_v7  ;;  %v1050_v27 = vor.u32 %v535_v0, %v534_v12 }
  0xa5   :  { %v1052_v38 = vor.u32 %v538_v2, %v537_v58  ;;  %vm1054_vm12 = vc.u32 %v91_v28, %v95_v52  ;;  %v542_v50 = vor.u32 %v541_v9, %v540_v32  ;;  %vm549_vm13 = vcmp.lt.s32.totalorder %v1035_v55, 4 }
  0xa6   :  { %v1060_v18 = vand.u32 65535, %v1019_v51  ;;  %v101_v45 = vadd.s32 %v95_v52, %v91_v28  ;;  %v559_v10 = vsel %vm549_vm13, %v545_v46, 1326507024  ;;  %v206_v59 = vand.u32 31, %v204_v30 }
  0xa7   :  { %v1064_v60 = vshll.u32 %v200_v11, 8  ;;  %vm546_vm14 = vcmp.lt.s32.totalorder %v1035_v55, 1  ;;  %vm547_vm15 = vcmp.lt.s32.totalorder %v1035_v55, 2  ;;  %vm548_vm0 = vcmp.lt.s32.totalorder %v1035_v55, 3 }
  0xa8   :  { %v97_v0 = vshll.u32 %v1045_v13, 16  ;;  %v554_v2 = vsel %vm546_vm14, %v1048_v25, %v1050_v27  ;;  %v558_v52 = vsel %vm546_vm14, %v1050_v27, %v1052_v38  ;;  %v1078_v5 = vshrl.u32 %v204_v30, 5 }
  0xa9   :  { %v1080_v7 = vsub.s32 32, %v206_v59  ;;  %v555_v9 = vsel %vm549_vm13, %v542_v50, 920167782  ;;  %v560_v11 = vsel %vm548_vm0, %v542_v50, %v559_v10  ;;  %v209_v12 = vshll.u32 %v1505_v63, %v206_v59 }
  0xaa   :  { %v212_v58 = vshll.u32 %v789_v49, %v206_v59  ;;  %v215_v30 = vshll.u32 %v786_v39, %v206_v59  ;;  %v218_v48 = vshll.u32 %v787_v41, %v206_v59  ;;  %v221_v10 = vshll.u32 %v788_v43, %v206_v59 }
  0xab   :  { %v210_v46 = vshrl.u32 %v789_v49, %v1080_v7  ;;  %v213_v28 = vshrl.u32 %v786_v39, %v1080_v7  ;;  %v216_v32 = vshrl.u32 %v787_v41, %v1080_v7  ;;  %v219_v50 = vshrl.u32 %v788_v43, %v1080_v7 }
  0xac   :  { %v222_v63 = vshrl.u32 %v785_v34, %v1080_v7  ;;  %vm224_vm1 = vcmp.lt.s32.totalorder %v1078_v5, 1  ;;  %v100_v41 = vsel %vm1054_vm12, 1, %v784_v1  ;;  %vm103_vm2 = vc.u32 %v101_v45, %v97_v0 }
  0xad   :  { %v1101_v35 = vor.u32 %v210_v46, %v209_v12  ;;  %v1103_v49 = vor.u32 %v213_v28, %v212_v58  ;;  %v1105_v6 = vor.u32 %v216_v32, %v215_v30  ;;  %v220_v39 = vor.u32 %v219_v50, %v218_v48 }
  0xae   :  { %v223_v44 = vor.u32 %v222_v63, %v221_v10  ;;  %v556_v43 = vsel %vm548_vm0, %v1052_v38, %v555_v9  ;;  %v1116_v34 = vsel %vm547_vm15, %v558_v52, %v560_v11  ;;  %vm227_vm3 = vcmp.lt.s32.totalorder %v1078_v5, 4 }
  0xaf   :  { %v236_v63 = vsel %vm224_vm1, %v1103_v49, %v1105_v6  ;;  %vm1126_vm4 = vc.u32 %v980_v20, %v417_v17  ;;  %vm226_vm5 = vcmp.lt.s32.totalorder %v1078_v5, 3  ;;  %v233_v48 = vsel %vm227_vm3, %v220_v39, 920167782 }
  0xb0   :  { %v237_v45 = vsel %vm227_vm3, %v223_v44, 1326507024  ;;  %v102_v59 = vadd.s32 %v100_v41, %v94_v19  ;;  %v1136_v0 = vshrl.u32 %v1019_v51, 16  ;;  %vm225_vm6 = vcmp.lt.s32.totalorder %v1078_v5, 2 }
  0xb1   :  { %v238_v17 = vsel %vm226_vm5, %v220_v39, %v237_v45  ;;  %v104_v20 = vsel %vm103_vm2, 1, %v784_v1  ;;  %v232_v52 = vsel %vm224_vm1, %v1101_v35, %v1103_v49  ;;  %v234_v44 = vsel %vm226_vm5, %v1105_v6, %v233_v48 }
  0xb2   :  { %v239_v19 = vsel %vm225_vm6, %v236_v63, %v238_v17  ;;  %v106_v9 = vadd.s32 %v104_v20, %v102_v59  ;;  %v1153_v11 = vsel %vm547_vm15, %v554_v2, %v556_v43  ;;  %v1508_v12 = vshrl.u32 %v1116_v34, 16 }
  0xb3   :  { %v244_v58 = vshrl.u32 %v239_v19, 16  ;;  %v96_v46 = vshrl.u32 %v990_v23, 16  ;;  %v1158_v28 = vand.u32 65535, %v1064_v60  ;;  %v98_v30 = vshrl.u32 %v1045_v13, 16 }
  0xb4   :  { %v1513_v32 = vand.u32 65535, %v969_v8  ;;  %v117_v10 = vshll.u32 %v1023_v54, 16  ;;  %v1167_v2 = vsel %vm225_vm6, %v232_v52, %v234_v44  ;;  %v1170_v39 = vshrl.u32 %v1064_v60, 16 }
  0xb5   :  { %v243_v41 = vand.u32 65535, %v239_v19  ;;  %v565_v13 = vand.u32 65535, %v1116_v34  ;;  %v107_v48 = vadd.s32 %v106_v9, %v96_v46  ;;  %v1183_v45 = vmul.u32 %v1508_v12, %v1060_v18 }
  0xb6   :  { %v115_v50 = vmul.u32 %v1513_v32, %v987_v22  ;;  %v1514_v23 = vmov %v1513_v32  ;;  %v1178_v22 = vmul.u32 %v244_v58, %v1158_v28  ;;  %v265_v20 = vand.u32 65535, %v1167_v2 }
  0xb7   :  { %v113_v43 = vmul.u32 %v1514_v23, %v930_v47  ;;  %v266_v47 = vshrl.u32 %v1167_v2, 16  ;;  %v1515_v52 = vand.u32 65535, %v902_v24  ;;  %v245_v19 = vmul.u32 %v243_v41, %v1158_v28 }
  0xb8   :  { %v119_v59 = vshll.u32 %v115_v50, 16  ;;  %v248_v9 = vmul.u32 %v244_v58, %v1170_v39  ;;  %v249_v32 = vshll.u32 %v1178_v22, 16  ;;  %v120_v12 = vshrl.u32 %v115_v50, 16 }
  0xb9   :  { %vm121_vm7 = vc.u32 %v113_v43, %v117_v10  ;;  %v123_v17 = vadd.s32 %v117_v10, %v113_v43  ;;  %v415_v44 = vmul.u32 %v1515_v52, %v925_v36  ;;  %v1195_v10 = vadd.s32 %v107_v48, %v98_v30 }
  0xba   :  { %v122_v8 = vsel %vm121_vm7, 1, %v784_v1  ;;  %v118_v43 = vshrl.u32 %v1023_v54, 16  ;;  %v422_v24 = vsel %vm1126_vm4, 1, %v784_v1  ;;  %v1516_v58 = vand.u32 65535, %v941_v53 }
  0xbb   :  { %v124_v46 = vadd.s32 %v122_v8, %v1026_v57  ;;  %vm125_vm8 = vc.u32 %v123_v17, %v119_v59  ;;  %v419_v2 = vshll.u32 %v415_v44, 16  ;;  %v1202_v52 = vadd.s32 %v123_v17, %v119_v59 }
  0xbc   :  { %v126_v23 = vsel %vm125_vm8, 1, %v784_v1  ;;  %v424_v57 = vadd.s32 %v422_v24, %v996_v33  ;;  %v435_v30 = vmul.u32 %v1516_v58, %v905_v26  ;;  %v1517_v54 = vmov %v1516_v58 }
  0xbd   :  { %v128_v63 = vadd.s32 %v126_v23, %v124_v46  ;;  %vm425_vm9 = vc.u32 %v1007_v40, %v419_v2  ;;  %v437_v50 = vmul.u32 %v1517_v54, %v925_v36  ;;  %v439_v37 = vshll.u32 %v1000_v3, 16 }
  0xbe   :  { %v426_v8 = vsel %vm425_vm9, 1, %v784_v1  ;;  %vm1214_vm10 = vc.u32 %v245_v19, %v249_v32  ;;  %v1219_v33 = vmul.u32 %v266_v47, %v1158_v28  ;;  %v418_v40 = vshrl.u32 %v949_v29, 16 }
  0xbf   :  { %v129_v48 = vadd.s32 %v128_v63, %v118_v43  ;;  %v428_v17 = vadd.s32 %v426_v8, %v424_v57  ;;  %vm133_vm11 = vc.u32 %v1195_v10, %v1202_v52  ;;  %v441_v63 = vshll.u32 %v437_v50, 16 }
  0xc0   :  { %vm443_vm12 = vc.u32 %v435_v30, %v439_v37  ;;  %v445_v46 = vadd.s32 %v439_v37, %v435_v30  ;;  %v247_v23 = vmul.u32 %v243_v41, %v1170_v39  ;;  %v255_v2 = vadd.s32 %v249_v32, %v245_v19 }
  0xc1   :  { %v130_v26 = vadd.s32 %v129_v48, %v120_v12  ;;  %v429_v53 = vadd.s32 %v428_v17, %v418_v40  ;;  %v444_v36 = vsel %vm443_vm12, 1, %v784_v1  ;;  %v270_v43 = vmul.u32 %v266_v47, %v1170_v39 }
  0xc2   :  { %v446_v58 = vadd.s32 %v444_v36, %v1010_v42  ;;  %v420_v29 = vshrl.u32 %v415_v44, 16  ;;  %v440_v12 = vshrl.u32 %v1000_v3, 16  ;;  %v442_v57 = vshrl.u32 %v437_v50, 16 }
  0xc3   :  { %v134_v24 = vadd.s32 1, %v130_v26  ;;  %vm447_vm2 = vc.u32 %v445_v46, %v441_v63  ;;  %v251_v54 = vshll.u32 %v247_v23, 16  ;;  %v254_v30 = vsel %vm1214_vm10, 1, %v784_v1 }
  0xc4   :  { %v448_v8 = vsel %vm447_vm2, 1, %v784_v1  ;;  %v1520_v41 = vmul.u32 %v871_v62, %v984_v21  ;;  %v1236_v19 = vadd.s32 %v429_v53, %v420_v29  ;;  %v267_v44 = vmul.u32 %v265_v20, %v1158_v28 }
  0xc5   :  { %v135_v48 = vsel %vm133_vm11, %v134_v24, %v130_v26  ;;  %v450_v42 = vadd.s32 %v448_v8, %v446_v58  ;;  %v256_v3 = vadd.s32 %v254_v30, %v248_v9  ;;  %vm257_vm4 = vc.u32 %v255_v2, %v251_v54 }
  0xc6   :  { %v136_v47 = vadd.s32 %v135_v48, %v1520_v41  ;;  %v269_v32 = vmul.u32 %v265_v20, %v1170_v39  ;;  %v271_v50 = vshll.u32 %v1219_v33, 16  ;;  %v250_v59 = vshrl.u32 %v1178_v22, 16 }
  0xc7   :  { %v451_v40 = vadd.s32 %v450_v42, %v440_v12  ;;  %v258_v17 = vsel %vm257_vm4, 1, %v784_v1  ;;  %v1243_v26 = vadd.s32 %v445_v46, %v441_v63  ;;  %v567_v39 = vmul.u32 %v565_v13, %v1060_v18 }
  0xc8   :  { %v137_v37 = vadd.s32 536870912, %v136_v47  ;;  %v260_v62 = vadd.s32 %v258_v17, %v256_v3  ;;  %v273_v21 = vshll.u32 %v269_v32, 16  ;;  %vm275_vm7 = vc.u32 %v267_v44, %v271_v50 }
  0xc9   :  { %v452_v28 = vadd.s32 %v451_v40, %v442_v57  ;;  %v276_v9 = vsel %vm275_vm7, 1, %v784_v1  ;;  %v277_v36 = vadd.s32 %v271_v50, %v267_v44  ;;  %vm455_vm8 = vc.u32 %v1236_v19, %v1243_v26 }
  0xca   :  { %v1245_v53 = vshrl.u32 %v137_v37, 30  ;;  %v261_v22 = vadd.s32 %v260_v62, %v250_v59  ;;  %v278_v20 = vadd.s32 %v276_v9, %v270_v43  ;;  %v229_v63 = vsel %vm227_vm3, %v1105_v6, 2102212464 }
  0xcb   :  { %v456_v2 = vadd.s32 1, %v452_v28  ;;  %vm279_vm9 = vc.u32 %v277_v36, %v273_v21  ;;  %v571_v24 = vshll.u32 %v1183_v45, 16  ;;  %v1521_v58 = vmov 683565275  }
  0xcc   :  { %v139_v46 = vshll.u32 %v1245_v53, 30  ;;  %v208_v29 = vshrl.u32 %v1521_v58, %v1080_v7  ;;  %v252_v12 = vshrl.u32 %v247_v23, 16  ;;  %v280_v57 = vsel %vm279_vm9, 1, %v784_v1 }
  0xcd   :  { %v457_v8 = vsel %vm455_vm8, %v456_v2, %v452_v28  ;;  %v272_v43 = vshrl.u32 %v1219_v33, 16  ;;  %v282_v54 = vadd.s32 %v280_v57, %v278_v20  ;;  %v230_v30 = vsel %vm226_vm5, %v1103_v49, %v229_v63 }
  0xce   :  { %v140_v48 = vsub.s32 %v136_v47, %v139_v46  ;;  %v228_v6 = vsel %vm224_vm1, %v208_v29, %v1101_v35  ;;  %v1522_v41 = vmul.u32 %v869_v61, %v973_v14  ;;  %v1271_v23 = vadd.s32 %v261_v22, %v252_v12 }
  0xcf   :  { %v283_v42 = vadd.s32 %v282_v54, %v272_v43  ;;  %v1276_v33 = vmul.u32 %v565_v13, %v1136_v0  ;;  %v530_v35 = vshrl.u32 %v1521_v58, %v993_v31  ;;  %v1523_v49 = vshrl.u32 %v1153_v11, 16 }
  0xd0   :  { %v458_v7 = vadd.s32 %v457_v8, %v1522_v41  ;;  %vm141_vm3 = vcmp.lt.s32.totalorder %v140_v48, 0  ;;  %v142_v47 = vsub.s32 0, %v140_v48  ;;  %v274_v14 = vshrl.u32 %v269_v32, 16 }
  0xd1   :  { %v1283_v44 = vmul.u32 %v1523_v49, %v1060_v18  ;;  %vm575_vm1 = vc.u32 %v567_v39, %v571_v24  ;;  %v577_v3 = vadd.s32 %v571_v24, %v567_v39  ;;  %v1285_v37 = vadd.s32 %v277_v36, %v273_v21 }
  0xd2   :  { %v459_v61 = vadd.s32 536870912, %v458_v7  ;;  %v143_v50 = vsel %vm141_vm3, %v142_v47, %v140_v48  ;;  %v231_v40 = vsel %vm225_vm6, %v228_v6, %v230_v30  ;;  %v284_v17 = vadd.s32 %v283_v42, %v274_v14 }
  0xd3   :  { %v144_v13 = vclz %v143_v50  ;;  %v551_v31 = vsel %vm549_vm13, %v1052_v38, 2102212464  ;;  %v587_v62 = vand.u32 65535, %v1153_v11  ;;  %vm287_vm5 = vc.u32 %v1271_v23, %v1285_v37 }
  0xd4   :  { %v1289_v59 = vshrl.u32 %v459_v61, 30  ;;  %v573_v32 = vshll.u32 %v1276_v33, 16  ;;  %v288_v5 = vadd.s32 1, %v284_v17  ;;  %v576_v9 = vsel %vm575_vm1, 1, %v784_v1 }
  0xd5   :  { %v746_v21 = vadd.s32 4294967294, %v144_v13  ;;  %v1524_v36 = vshrl.u32 %v1116_v34, 16  ;;  %v285_v22 = vmul.u32 %v1064_v60, %v231_v40  ;;  %v132_v38 = vadd.s32 %v1202_v52, %v1195_v10 }
  0xd6   :  { %v461_v28 = vshll.u32 %v1289_v59, 30  ;;  %vm579_vm13 = vc.u32 %v577_v3, %v573_v32  ;;  %v289_v63 = vsel %vm287_vm5, %v288_v5, %v284_v17  ;;  %v593_v46 = vshll.u32 %v1283_v44, 16 }
  0xd7   :  { %v570_v39 = vmul.u32 %v1524_v36, %v1136_v0  ;;  %vm747_vm6 = vcmp.lt.s32.totalorder %v746_v21, 0  ;;  %v290_v24 = vadd.s32 %v289_v63, %v285_v22  ;;  %v589_v29 = vmul.u32 %v587_v62, %v1060_v18 }
  0xd8   :  { %v1306_v20 = vsub.s32 %v458_v7, %v461_v28  ;;  %v147_v2 = vsel %vm747_vm6, 0, %v746_v21  ;;  %v580_v60 = vsel %vm579_vm13, 1, %v784_v1  ;;  %v550_v10 = vsel %vm546_vm14, %v530_v35, %v1048_v25 }
  0xd9   :  { %v578_v58 = vadd.s32 %v576_v9, %v570_v39  ;;  %v148_v12 = vsub.s32 32, %v147_v2  ;;  %v152_v34 = vsub.s32 4294967266, %v147_v2  ;;  %v291_v57 = vadd.s32 536870912, %v290_v24 }
  0xda   :  { %vm463_vm10 = vcmp.lt.s32.totalorder %v1306_v20, 0  ;;  %v464_v52 = vsub.s32 0, %v1306_v20  ;;  %v591_v8 = vmul.u32 %v587_v62, %v1136_v0  ;;  %v149_v43 = vshll.u32 %v140_v48, %v147_v2 }
  0xdb   :  { %v150_v54 = vshrl.u32 %v132_v38, %v148_v12  ;;  %v153_v6 = vadd.s32 127, %v152_v34  ;;  %vm597_vm11 = vc.u32 %v589_v29, %v593_v46  ;;  %v552_v18 = vsel %vm548_vm0, %v1050_v27, %v551_v31 }
  0xdc   :  { %v1525_v30 = vmov %v1523_v49  ;;  %v465_v7 = vsel %vm463_vm10, %v464_v52, %v1306_v20  ;;  %v582_v25 = vadd.s32 %v580_v60, %v578_v58  ;;  %v1324_v49 = vshrl.u32 %v291_v57, 30 }
  0xdd   :  { %v592_v41 = vmul.u32 %v1525_v30, %v1136_v0  ;;  %v151_v47 = vor.u32 %v150_v54, %v149_v43  ;;  %v154_v42 = vshll.u32 %v153_v6, 23  ;;  %v466_v35 = vclz %v465_v7 }
  0xde   :  { %vm40_vm14 = vcmp.lt.s32.totalorder %v836_v16, 0  ;;  %v572_v48 = vshrl.u32 %v1183_v45, 16  ;;  %v595_v61 = vshll.u32 %v591_v8, 16  ;;  %v598_v14 = vsel %vm597_vm11, 1, %v784_v1 }
  0xdf   :  { %v599_v27 = vadd.s32 %v593_v46, %v589_v29  ;;  %v155_v3 = vor.u32 4788187, %v154_v42  ;;  %v454_v0 = vadd.s32 %v1243_v26, %v1236_v19  ;;  %v752_v11 = vadd.s32 4294967294, %v466_v35 }
  0xe0   :  { %v293_v50 = vshll.u32 %v1324_v49, 30  ;;  %v158_v40 = vcvt.s32.f32 %v151_v47  ;;  %v583_v13 = vadd.s32 %v582_v25, %v572_v48  ;;  %v600_v17 = vadd.s32 %v598_v14, %v592_v41 }
  0xe1   :  { %vm601_vm0 = vc.u32 %v599_v27, %v595_v61  ;;  %v156_v31 = vand.u32 2147483647, %v155_v3  ;;  %vm753_vm12 = vcmp.lt.s32.totalorder %v752_v11, 0  ;;  %v574_v21 = vshrl.u32 %v1276_v33, 16 }
  0xe2   :  { %v1332_v62 = vsub.s32 %v290_v24, %v293_v50  ;;  %v602_v45 = vsel %vm601_vm0, 1, %v784_v1  ;;  %v469_v32 = vsel %vm753_vm12, 0, %v752_v11  ;;  %v594_v28 = vshrl.u32 %v1283_v44, 16 }
  0xe3   :  { %v604_v5 = vadd.s32 %v602_v45, %v600_v17  ;;  %v159_v19 = vmul.f32 %v158_v40, %v156_v31  ;;  %v470_v26 = vsub.s32 32, %v469_v32  ;;  %v474_v9 = vsub.s32 4294967266, %v469_v32 }
  0xe4   :  { %v596_v36 = vshrl.u32 %v591_v8, 16  ;;  %vm295_vm2 = vcmp.lt.s32.totalorder %v1332_v62, 0  ;;  %v296_v39 = vsub.s32 0, %v1332_v62  ;;  %v1339_v22 = vadd.s32 %v583_v13, %v574_v21 }
  0xe5   :  { %v605_v38 = vadd.s32 %v604_v5, %v594_v28  ;;  %v160_v63 = vxor.u32 2147483648, %v159_v19  ;;  %v471_v1 = vshll.u32 %v1306_v20, %v469_v32  ;;  %v472_v46 = vshrl.u32 %v454_v0, %v470_v26 }
  0xe6   :  { %v475_v2 = vadd.s32 127, %v474_v9  ;;  %v1526_v33 = vand.u32 2147483647, %v836_v16  ;;  %v297_v24 = vsel %vm295_vm2, %v296_v39, %v1332_v62  ;;  %v1349_v58 = vadd.s32 %v599_v27, %v595_v61 }
  0xe7   :  { %v606_v29 = vadd.s32 %v605_v38, %v596_v36  ;;  %v161_v12 = vsel %vm40_vm14, %v160_v63, %v159_v19  ;;  %v473_v34 = vor.u32 %v472_v46, %v471_v1  ;;  %v298_v52 = vclz %v297_v24 }
  0xe8   :  { %vm1344_vm4 = vcmp.le.f32.partialorder %v1526_v33, 0.7853982  ;;  %v476_v60 = vshll.u32 %v475_v2, 23  ;;  %v553_v20 = vsel %vm547_vm15, %v550_v10, %v552_v18  ;;  %vm609_vm7 = vc.u32 %v1339_v22, %v1349_v58 }
  0xe9   :  { %v164_v57 = vsel %vm1344_vm4, %v836_v16, %v161_v12  ;;  %v749_v54 = vadd.s32 4294967294, %v298_v52  ;;  %v610_v6 = vadd.s32 1, %v606_v29  ;;  %v480_v25 = vcvt.s32.f32 %v473_v34 }
  0xea   :  { %v166_v8 = vmul.f32 %v164_v57, %v164_v57  ;;  %v477_v43 = vor.u32 4788187, %v476_v60  ;;  %vm362_vm8 = vcmp.lt.s32.totalorder %v834_v15, 0  ;;  %v607_v55 = vmul.u32 %v1019_v51, %v553_v20 }
  0xeb   :  { %vm750_vm15 = vcmp.lt.s32.totalorder %v749_v54, 0  ;;  %v611_v10 = vsel %vm609_vm7, %v610_v6, %v606_v29  ;;  %v286_v48 = vadd.s32 %v1285_v37, %v1271_v23  ;;  %v162_v3 = vsub.s32 4, %v1245_v53 }
  0xec   :  { %v167_v30 = vmul.f32 -0.001358992, %v166_v8  ;;  %v174_v41 = vmul.f32 -0.00019511016, %v166_v8  ;;  %v478_v7 = vand.u32 2147483647, %v477_v43  ;;  %v612_v27 = vadd.s32 %v611_v10, %v607_v55 }
  0xed   :  { %v301_v35 = vsel %vm750_vm15, 0, %v749_v54  ;;  %v1529_v32 = vand.u32 2147483647, %v834_v15  ;;  %v163_v19 = vsel %vm40_vm14, %v162_v3, %v1245_v53  ;;  %v484_v9 = vsub.s32 4, %v1289_v59 }
  0xee   :  { %v168_v18 = vadd.f32 0.041655596, %v167_v30  ;;  %v175_v47 = vadd.f32 0.008332121, %v174_v41  ;;  %v481_v42 = vmul.f32 %v480_v25, %v478_v7  ;;  %v302_v61 = vsub.s32 32, %v301_v35 }
  0xef   :  { %v306_v14 = vsub.s32 4294967266, %v301_v35  ;;  %v303_v40 = vshll.u32 %v1332_v62, %v301_v35  ;;  %v613_v17 = vadd.s32 536870912, %v612_v27  ;;  %vm1368_vm9 = vcmp.le.f32.partialorder %v1529_v32, 0.7853982 }
  0xf0   :  { %v169_v0 = vmul.f32 %v168_v18, %v166_v8  ;;  %v176_v11 = vmul.f32 %v175_v47, %v166_v8  ;;  %v482_v50 = vxor.u32 2147483648, %v481_v42  ;;  %v304_v51 = vshrl.u32 %v286_v48, %v302_v61 }
  0xf1   :  { %v307_v13 = vadd.s32 127, %v306_v14  ;;  %v1377_v5 = vshrl.u32 %v613_v17, 30  ;;  %v165_v33 = vsel %vm1344_vm4, 0, %v163_v19  ;;  %v485_v53 = vsel %vm362_vm8, %v484_v9, %v1289_v59 }
  0xf2   :  { %v170_v31 = vadd.f32 -0.4999988, %v169_v0  ;;  %v177_v45 = vadd.f32 -0.16666654, %v176_v11  ;;  %v483_v23 = vsel %vm362_vm8, %v482_v50, %v481_v42  ;;  %v305_v28 = vor.u32 %v304_v51, %v303_v40 }
  0xf3   :  { %v486_v37 = vsel %vm1368_vm9, %v834_v15, %v483_v23  ;;  %v308_v62 = vshll.u32 %v307_v13, 23  ;;  %v615_v63 = vshll.u32 %v1377_v5, 30  ;;  %v182_v54 = vand.u32 3, %v165_v33 }
  0xf4   :  { %v178_v26 = vmul.f32 %v177_v45, %v166_v8  ;;  %v488_v36 = vmul.f32 %v486_v37, %v486_v37  ;;  %v171_v39 = vmul.f32 %v170_v31, %v166_v8  ;;  %v312_v29 = vcvt.s32.f32 %v305_v28 }
  0xf5   :  { %v309_v38 = vor.u32 4788187, %v308_v62  ;;  %v1386_v12 = vsub.s32 %v612_v27, %v615_v63  ;;  %vm194_vm1 = vcmp.lt.s32.totalorder %v878_v4, 0  ;;  %v487_v59 = vsel %vm1368_vm9, 0, %v485_v53 }
  0xf6   :  { %v179_v1 = vadd.f32 1.0, %v178_v26  ;;  %v489_v46 = vmul.f32 -0.001358992, %v488_v36  ;;  %v496_v2 = vmul.f32 -0.00019511016, %v488_v36  ;;  %v172_v20 = vadd.f32 1.0, %v171_v39 }
  0xf7   :  { %v310_v24 = vand.u32 2147483647, %v309_v38  ;;  %vm617_vm3 = vcmp.lt.s32.totalorder %v1386_v12, 0  ;;  %v618_v43 = vsub.s32 0, %v1386_v12  ;;  %v1532_v18 = vand.u32 2147483647, %v878_v4 }
  0xf8   :  { %v180_v34 = vmul.f32 %v179_v1, %v164_v57  ;;  %v490_v60 = vadd.f32 0.041655596, %v489_v46  ;;  %v497_v52 = vadd.f32 0.008332121, %v496_v2  ;;  %v188_v10 = vxor.u32 2147483648, %v172_v20 }
  0xf9   :  { %v313_v8 = vmul.f32 %v312_v29, %v310_v24  ;;  %v619_v57 = vsel %vm617_vm3, %v618_v43, %v1386_v12  ;;  %vm1399_vm5 = vcmp.le.f32.partialorder %v1532_v18, 0.7853982  ;;  %vm184_vm13 = vcmp.eq.s32.totalorder %v182_v54, 0 }
  0xfa   :  { %v491_v44 = vmul.f32 %v490_v60, %v488_v36  ;;  %v498_v6 = vmul.f32 %v497_v52, %v488_v36  ;;  %v185_v30 = vxor.u32 2147483648, %v180_v34  ;;  %v620_v55 = vclz %v619_v57 }
  0xfb   :  { %v314_v41 = vxor.u32 2147483648, %v313_v8  ;;  %v504_v27 = vand.u32 3, %v487_v59  ;;  %vm187_vm6 = vcmp.eq.s32.totalorder %v182_v54, 2  ;;  %vm183_vm10 = vcmp.lt.s32.totalorder %v182_v54, 2 }
  0xfc   :  { %v492_v7 = vadd.f32 -0.4999988, %v491_v44  ;;  %v499_v25 = vadd.f32 -0.16666654, %v498_v6  ;;  %v186_v14 = vsel %vm184_vm13, %v172_v20, %v185_v30  ;;  %v755_v0 = vadd.s32 4294967294, %v620_v55 }
  0xfd   :  { %v315_v42 = vsel %vm194_vm1, %v314_v41, %v313_v8  ;;  %v189_v40 = vsel %vm187_vm6, %v188_v10, %v180_v34  ;;  %vm181_vm14 = vweird.f32 %v836_v16  ;;  %vm505_vm0 = vcmp.lt.s32.totalorder %v504_v27, 2 }
  0xfe   :  { %v493_v35 = vmul.f32 %v492_v7, %v488_v36  ;;  %v500_v48 = vmul.f32 %v499_v25, %v488_v36  ;;  %v1408_v61 = vsel %vm1399_vm5, %v878_v4, %v315_v42  ;;  %vm756_vm11 = vcmp.lt.s32.totalorder %v755_v0, 0 }
  0xff   :  { %v320_v3 = vmul.f32 %v1408_v61, %v1408_v61  ;;  %v190_v13 = vsel %vm183_vm10, %v186_v14, %v189_v40  ;;  %v623_v45 = vsel %vm756_vm11, 0, %v755_v0  ;;  %v608_v32 = vadd.s32 %v1349_v58, %v1339_v22 }
 0x100   :  { %v494_v11 = vadd.f32 1.0, %v493_v35  ;;  %v501_v50 = vadd.f32 1.0, %v500_v48  ;;  %v624_v21 = vsub.s32 32, %v623_v45  ;;  %vm506_vm12 = vcmp.eq.s32.totalorder %v504_v27, 0 }
 0x101   :  { %v328_v51 = vmul.f32 -0.00019511016, %v320_v3  ;;  %v628_v62 = vsub.s32 4294967266, %v623_v45  ;;  %v191_v19 = vsel %vm181_vm14, nan, %v190_v13  ;;  %vm509_vm2 = vcmp.eq.s32.totalorder %v504_v27, 2 }
 0x102   :  { %v502_v17 = vmul.f32 %v501_v50, %v486_v37  ;;  %v510_v31 = vxor.u32 2147483648, %v494_v11  ;;  %v321_v26 = vmul.f32 -0.001358992, %v320_v3  ;;  %v626_v9 = vshrl.u32 %v608_v32, %v624_v21 }
 0x103   :  { %v329_v28 = vadd.f32 0.008332121, %v328_v51  ;;  %v625_v37 = vshll.u32 %v1386_v12, %v623_v45  ;;  %v629_v38 = vadd.s32 127, %v628_v62  ;;  %vm503_vm4 = vweird.f32 %v834_v15 }
 0x104   :  { %v507_v23 = vxor.u32 2147483648, %v502_v17  ;;  %v511_v39 = vsel %vm509_vm2, %v510_v31, %v502_v17  ;;  %v322_v2 = vadd.f32 0.041655596, %v321_v26  ;;  %vm516_vm7 = vcmp.lt.s32.totalorder %v862_v56, 0 }
 0x105   :  { %v330_v22 = vmul.f32 %v329_v28, %v320_v3  ;;  %v627_v58 = vor.u32 %v626_v9, %v625_v37  ;;  %v630_v1 = vshll.u32 %v629_v38, 23  ;;  %v316_v52 = vsub.s32 4, %v1324_v49  ;;  %v700_v37 = vld [vmem:[%s1498_s1 + $0x30] sm:$0xff]  ;;  %v699_v38 = vld [vmem:[%s1498_s1 + $0x28] sm:$0xff] }
 0x106   :  { %v508_v36 = vsel %vm506_vm12, %v494_v11, %v507_v23  ;;  %v323_v12 = vmul.f32 %v322_v2, %v320_v3  ;;  %v1535_v8 = vand.u32 2147483647, %v862_v56  ;;  %v638_v25 = vsub.s32 4, %v1377_v5 }
 0x107   :  { %v512_v16 = vsel %vm505_vm0, %v508_v36, %v511_v39  ;;  %v631_v33 = vor.u32 4788187, %v630_v1  ;;  %v331_v24 = vadd.f32 -0.16666654, %v330_v22  ;;  %v634_v29 = vcvt.s32.f32 %v627_v58  ;;  %v703_v39 = vld [vmem:[%s1498_s1 + $0x48] sm:$0x7] }
 0x108   :  { %v513_v63 = vsel %vm503_vm4, nan, %v512_v16  ;;  %v324_v20 = vadd.f32 -0.4999988, %v323_v12  ;;  %vm1428_vm8 = vcmp.le.f32.partialorder %v1535_v8, 0.7853982  ;;  %v317_v41 = vsel %vm194_vm1, %v316_v52, %v1324_v49  ;;  %v698_v16 = vld [vmem:[%s1498_s1 + $0x20] sm:$0xff] }
 0x109   :  { %v1418_v46 = vmul.f32 %v513_v63, %v191_v19  ;;  %v632_v15 = vand.u32 2147483647, %v631_v33  ;;  %v332_v53 = vmul.f32 %v331_v24, %v320_v3  ;;  %v319_v55 = vsel %vm1399_vm5, 0, %v317_v41  ;;  %v697_v63 = vld [vmem:[%s1498_s1 + $0x18] sm:$0xff]  ;;  %v696_v22 = vld [vmem:[%s1498_s1 + $0x10] sm:$0xff]  ;;  %v695_v58 = vld [vmem:[%s1498_s1 + $0x8] sm:$0xff] }
 0x10a   :  { %v325_v57 = vmul.f32 %v324_v20, %v320_v3  ;;  %v336_v27 = vand.u32 3, %v319_v55  ;;  %v639_v49 = vsel %vm516_vm7, %v638_v25, %v1377_v5  ;;  %vm335_vm1 = vweird.f32 %v878_v4  ;;  %v702_v4 = vld [vmem:[%s1498_s1 + $0x40] sm:$0xff] }
 0x10b   :  { %678 = vrot.lane.b32.xlu0 %v1418_v46, %s791_s0  ;;  %672 = vrot.lane.b32.xlu2 %v1418_v46, %s792_s2  ;;  %v635_v34 = vmul.f32 %v634_v29, %v632_v15  ;;  %v333_v6 = vadd.f32 1.0, %v332_v53  ;;  %v641_v47 = vsel %vm1428_vm8, 0, %v639_v49  ;;  %vm657_vm10 = vweird.f32 %v862_v56  ;;  %v694_v1 = vld [vmem:[%s1498_s1] sm:$0xff]  ;;  %v691_v53 = vld [vmem:[%s1499_s3 + $0x8] sm:$0xff] }
 0x10c   :  { %v326_v35 = vadd.f32 1.0, %v325_v57  ;;  %vm338_vm15 = vcmp.eq.s32.totalorder %v336_v27, 0  ;;  %vm341_vm9 = vcmp.eq.s32.totalorder %v336_v27, 2  ;;  %v658_v31 = vand.u32 3, %v641_v47  ;;  %v690_v33 = vld [vmem:[%s1499_s3] sm:$0xff] }
 0x10d   :  { %v636_v60 = vxor.u32 2147483648, %v635_v34  ;;  %v334_v10 = vmul.f32 %v333_v6, %v1408_v61  ;;  %vm337_vm3 = vcmp.lt.s32.totalorder %v336_v27, 2  ;;  %vm711_vm11 = vcmask 1042432  }
 0x10e   :  { %v342_v50 = vxor.u32 2147483648, %v326_v35  ;;  %vm660_vm5 = vcmp.eq.s32.totalorder %v658_v31, 0  ;;  %vm663_vm13 = vcmp.eq.s32.totalorder %v658_v31, 2  ;;  %vm659_vm6 = vcmp.lt.s32.totalorder %v658_v31, 2  ;;  %757 = vmatpush.msk.msra.mxu0 %vm711_vm11, %v703_v39  ;;  %760 = vmatpush.msk.msra.mxu1 %vm711_vm11, %v703_v39 }
 0x10f   :  { %v637_v54 = vsel %vm516_vm7, %v636_v60, %v635_v34  ;;  %v339_v3 = vxor.u32 2147483648, %v334_v10  ;;  %vm684_vm14 = vcmask 203776   ;;  %vm687_vm0 = vcmask 408576  }
 0x110   :  { %v640_v44 = vsel %vm1428_vm8, %v862_v56, %v637_v54  ;;  %v343_v45 = vsel %vm341_vm9, %v342_v50, %v334_v10  ;;  %v701_v56 = vld [vmem:[%s1498_s1 + $0x38] sm:$0xff]  ;;  %722 = vmatpush.msra.mxu0 %v702_v4  ;;  %761 = vmatpush.msra.mxu1 %v702_v4  ;;  %vm704_vm12 = vcmask 613376   ;;  %vm738_vm2 = vcmask 23552  }
 0x111   :  { %v642_v30 = vmul.f32 %v640_v44, %v640_v44  ;;  %v340_v61 = vsel %vm338_vm15, %v326_v35, %v339_v3 }
 0x112   :  { %v344_v5 = vsel %vm337_vm3, %v340_v61, %v343_v45  ;;  %723 = vmatpush.msra.mxu0 %v701_v56  ;;  %762 = vmatpush.msra.mxu1 %v701_v56 }
 0x113   :  { %v643_v59 = vmul.f32 -0.001358992, %v642_v30  ;;  %v650_v7 = vmul.f32 -0.00019511016, %v642_v30  ;;  %v345_v28 = vsel %vm335_vm1, nan, %v344_v5 }
 0x114   :  { %724 = vmatpush.msra.mxu0 %v700_v37  ;;  %763 = vmatpush.msra.mxu1 %v700_v37 }
 0x115   :  { %v644_v18 = vadd.f32 0.041655596, %v643_v59  ;;  %v651_v42 = vadd.f32 0.008332121, %v650_v7 }
 0x116   :  { %725 = vmatpush.msra.mxu0 %v699_v38  ;;  %764 = vmatpush.msra.mxu1 %v699_v38 }
 0x117   :  { %v645_v48 = vmul.f32 %v644_v18, %v642_v30  ;;  %v652_v14 = vmul.f32 %v651_v42, %v642_v30 }
 0x118   :  { %726 = vmatpush.msra.mxu0 %v698_v16  ;;  %765 = vmatpush.msra.mxu1 %v698_v16 }
 0x119   :  { %v646_v0 = vadd.f32 -0.4999988, %v645_v48  ;;  %v653_v11 = vadd.f32 -0.16666654, %v652_v14 }
 0x11a   :  { %727 = vmatpush.msra.mxu0 %v697_v63  ;;  %766 = vmatpush.msra.mxu1 %v697_v63 }
 0x11b   :  { %v647_v40 = vmul.f32 %v646_v0, %v642_v30  ;;  %v654_v51 = vmul.f32 %v653_v11, %v642_v30 }
 0x11c   :  { %728 = vmatpush.msra.mxu0 %v696_v22  ;;  %767 = vmatpush.msra.mxu1 %v696_v22 }
 0x11d   :  { %v648_v13 = vadd.f32 1.0, %v647_v40  ;;  %v655_v17 = vadd.f32 1.0, %v654_v51 }
 0x11e   :  { %729 = vmatpush.msra.mxu0 %v695_v58  ;;  %768 = vmatpush.msra.mxu1 %v695_v58 }
 0x11f   :  { %v656_v32 = vmul.f32 %v655_v17, %v640_v44  ;;  %v664_v21 = vxor.u32 2147483648, %v648_v13 }
 0x120   :  { %730 = vmatpush.msra.mxu0 %v694_v1  ;;  %769 = vmatpush.msra.mxu1 %v694_v1 }
 0x121   :  { %v661_v23 = vxor.u32 2147483648, %v656_v32  ;;  %v665_v19 = vsel %vm663_vm13, %v664_v21, %v656_v32 }
 0x123   :  { %v662_v62 = vsel %vm660_vm5, %v648_v13, %v661_v23 }
 0x124   :  { %v666_v26 = vsel %vm659_vm6, %v662_v62, %v665_v19 }
 0x125   :  { %v667_v9 = vsel %vm657_vm10, nan, %v666_v26 }
 0x126   :  { %v669_v36 = vmul.f32 %v667_v9, %v345_v28 }
 0x128   :  { %680 = vrot.lane.b32.xlu1 %v669_v36, %s791_s0  ;;  %674 = vrot.lane.b32.xlu2 %v669_v36, %s792_s2 }
 0x165   :  { %v673_v2 = vpop.permute.xlu2 %672 }
 0x166   :  { %v685_v24 = vsel %vm684_vm14, %v1418_v46, %v673_v2 }
 0x17d   :  { %v679_v15 = vpop.permute.xlu0 %678 }
 0x17e   :  { %v688_v29 = vsel %vm687_vm0, %v685_v24, %v679_v15 }
 0x17f   :  { %v692_v12 = vmul.f32 %v690_v33, %v688_v29 }
 0x181   :  { %758 = vmatmul.msk.f32.vlgmr.msra.gmra.mxu0 %vm704_vm12, %v692_v12 }
 0x182   :  { %v675_v34 = vpop.permute.xlu2 %674 }
 0x183   :  { %v686_v60 = vsel %vm684_vm14, %v669_v36, %v675_v34 }
 0x19a   :  { %v681_v52 = vpop.permute.xlu1 %680 }
 0x19b   :  { %v689_v20 = vsel %vm687_vm0, %v686_v60, %v681_v52 }
 0x19c   :  { %v693_v8 = vmul.f32 %v691_v53, %v689_v20 }
 0x19e   :  { %759 = vmatmul.msk.f32.vlgmr.msra.gmra.mxu1 %vm704_vm12, %v693_v8 }
 0x1fe   :  { %v732_v43 = vpop.f32.mrf.mxu0 }
 0x1ff   :  { %739 = vst.msk [vmem:[%s1500_s4] sm:$0xff] %vm738_vm2, %v732_v43 }
 0x21b   :  { %v735_v46 = vpop.f32.mrf.mxu1 }
 0x21c   :  { %740 = vst.msk [vmem:[%s1500_s4 + $0x8] sm:$0xff] %vm738_vm2, %v735_v46 }

</bundles_post_ra>
